<compile_context>
chip_gen: v5e
topology: v5e:2x2
jax: 0.10.0
libtpu: 0.0.40
codegen_flags: <defaults>
</compile_context>

<pallas_src>
import functools

import jax
import jax.numpy as jnp
import numpy as np
from jax.experimental import pallas as pl
from jax.experimental.pallas import tpu as pltpu


def _cdiv(a, b):
    return -(-a // b)


def _round_up(a, b):
    return _cdiv(a, b) * b


def _pad2(a, rows, cols):
    pr, pc = rows - a.shape[0], cols - a.shape[1]
    if pr or pc:
        a = jnp.pad(a, ((0, pr), (0, pc)))
    return a


def _tile_caps():
    """(tm_max, tn_max, tk_max, vmem_limit_bytes) tuned per chip generation."""
    try:
        cap = int(getattr(pltpu.get_tpu_info(), "vmem_capacity_bytes", 0))
    except Exception:  # pragma: no cover - be robust if the query is missing
        cap = 0
    if cap >= (96 << 20):
        # v5e / v6e (128 MiB VMEM): big tiles (~20 MiB double-buffered worst
        # case); raise the scoped limit past v5e's 16 MiB default.
        return 1024, 1024, 512, 64 << 20
    # v7x (64 MiB per TensorCore) or unknown: 512-tiles (~7 MiB double-buffered)
    # fit the default scoped VMEM on every generation.
    return 512, 512, 512, None


def _choose_tile(size, align, max_tile, min_blocks=1):
    """Pick (padded_size, tile, num_blocks).

    `tile` is a multiple of `align`, tile <= max(max_tile, align), and
    padded_size = tile * num_blocks >= size with < `align` waste per block
    (instead of rounding `size` up to a whole multiple of `max_tile`).
    """
    padded = _round_up(size, align)
    n = max(min_blocks, _cdiv(padded, max_tile))
    tile = _round_up(_cdiv(padded, n), align)
    n = _cdiv(padded, tile)
    return tile * n, tile, n


# ----------------------------- kernels ------------------------------------ #


def _kernel_single_k(x_ref, w_ref, b_ref, o_ref, *, compute_dtype):
    # Whole contraction fits in one k step: no scratch, no init pass.
    o_ref[...] = (
        jnp.dot(
            x_ref[...].astype(compute_dtype),
            w_ref[...].astype(compute_dtype),
            preferred_element_type=jnp.float32,
        )
        + b_ref[...]
    ).astype(o_ref.dtype)


def _kernel_multi_k(x_ref, w_ref, b_ref, o_ref, acc_ref, *, compute_dtype):
    k = pl.program_id(2)
    part = jnp.dot(
        x_ref[...].astype(compute_dtype),
        w_ref[...].astype(compute_dtype),
        preferred_element_type=jnp.float32,
    )

    @pl.when(k == 0)
    def _():  # first k step: direct write (no zero-init store + add pass)
        acc_ref[...] = part

    @pl.when(k != 0)
    def _():
        acc_ref[...] += part

    @pl.when(k == pl.num_programs(2) - 1)
    def _():  # bias added once, on the last k step only
        o_ref[...] = (acc_ref[...] + b_ref[...]).astype(o_ref.dtype)


# ----------------------------- wrapper ------------------------------------ #


@functools.partial(jax.jit, static_argnames=("img_size", "patch_size", "use_bf16"))
def vec_to_patch(x, weight, bias, *, img_size, patch_size, use_bf16=False):
    """Pallas implementation of VecToPatch.forward.

    x:      (B, N, hidden)           N == (img_size // patch_size) ** 2
    weight: (hidden, C_out, P, P)    PyTorch ConvTranspose2d weight layout
    bias:   (C_out,)
    returns (B, C_out, img, img); C_out axis squeezed iff C_out == 1
            (matching torch's .squeeze(1)).
    """
    B, N, H = x.shape
    P = patch_size
    g = img_size // patch_size
    assert N == g * g, "sequence length must equal num_patches"
    C_out = weight.shape[1]
    K = C_out * P * P
    M = B * N

    tm_max, tn_max, tk_max, vmem_limit = _tile_caps()

    # Split M into >=2 blocks when it is big enough so v7x's two TensorCores
    # both get work on the "parallel" axes (negligible cost on 1-TC chips).
    min_blocks_m = 2 if _round_up(M, 8) >= 256 else 1
    M_pad, tm, ni = _choose_tile(M, 8, tm_max, min_blocks=min_blocks_m)
    K_pad, tn, nj = _choose_tile(K, 128, tn_max)
    H_pad, tk, nk = _choose_tile(H, 128, tk_max)

    # Zero padding is numerically exact; padding is sliced off below.
    x2 = _pad2(x.reshape(M, H), M_pad, H_pad)
    w2 = _pad2(weight.reshape(H, K), H_pad, K_pad)
    b2 = jnp.broadcast_to(
        bias.reshape(1, C_out, 1, 1), (1, C_out, P, P)
    ).reshape(1, K)
    b2 = _pad2(b2.astype(jnp.float32), 1, K_pad)

    # bf16 MXU feed is cast in-kernel (no extra HBM pass); f32 accumulation.
    compute_dtype = jnp.bfloat16 if use_bf16 else x.dtype

    if nk == 1:
        kernel = functools.partial(_kernel_single_k, compute_dtype=compute_dtype)
        scratch = []
    else:
        kernel = functools.partial(_kernel_multi_k, compute_dtype=compute_dtype)
        scratch = [pltpu.VMEM((tm, tn), jnp.float32)]

    itemsize = jnp.dtype(x.dtype).itemsize
    cost = pl.CostEstimate(
        flops=2 * M_pad * H_pad * K_pad,
        transcendentals=0,
        bytes_accessed=itemsize * (M_pad * H_pad + H_pad * K_pad + M_pad * K_pad),
    )

    out2 = pl.pallas_call(
        kernel,
        out_shape=jax.ShapeDtypeStruct((M_pad, K_pad), x.dtype),
        grid_spec=pltpu.PrefetchScalarGridSpec(
            num_scalar_prefetch=0,
            # j (output cols) outermost, i (rows) middle, k (reduction) last:
            # the weight tile (k, j) stays resident across the inner i loop
            # when nk == 1 (Pallas skips the re-DMA).
            grid=(nj, ni, nk),
            in_specs=[
                pl.BlockSpec((tm, tk), lambda j, i, k: (i, k)),   # x
                pl.BlockSpec((tk, tn), lambda j, i, k: (k, j)),   # weight
                pl.BlockSpec((1, tn), lambda j, i, k: (0, j)),    # bias (f32)
            ],
            out_specs=pl.BlockSpec((tm, tn), lambda j, i, k: (i, j)),
            scratch_shapes=scratch,
        ),
        compiler_params=pltpu.CompilerParams(
            dimension_semantics=("parallel", "parallel", "arbitrary"),
            vmem_limit_bytes=vmem_limit,
        ),
        cost_estimate=cost,
    )(x2, w2, b2)

    # Patch scatter back to NCHW. Runs under the same jit as the kernel, so
    # slice + reshape + transpose fuse into a single copy (see TODO above).
    out2 = out2[:M, :K]
    out = out2.reshape(B, g, g, C_out, P, P)
    out = out.transpose(0, 3, 1, 4, 2, 5)  # (B, C_out, g, P, g, P)
    out = out.reshape(B, C_out, img_size, img_size)
    if C_out == 1:  # torch .squeeze(1) semantics
        out = jnp.squeeze(out, axis=1)
    return out


# ----------------------------- test harness -------------------------------- #


def _reference(x, weight, bias, *, img_size, patch_size):
    # Pure-JAX reference: same math, full f32 precision, no Pallas.
    B, N, H = x.shape
    P = patch_size
    g = img_size // patch_size
    C_out = weight.shape[1]
    y = jnp.einsum(
        "bnh,hcpq->bncpq", x, weight, precision=jax.lax.Precision.HIGHEST
    ) + bias[None, None, :, None, None]
    y = y.reshape(B, g, g, C_out, P, P).transpose(0, 3, 1, 4, 2, 5)
    y = y.reshape(B, C_out, img_size, img_size)
    if C_out == 1:
        y = jnp.squeeze(y, axis=1)
    return y


def _run_case(key, *, batch, img_size, patch_size, hidden_size):
    g = img_size // patch_size
    num_patches = g * g
    c_out = hidden_size // img_size

    kx, kw, kb = jax.random.split(key, 3)
    weight = jax.random.normal(
        kw, (hidden_size, c_out, patch_size, patch_size), dtype=jnp.float32
    ) * 0.02
    bias = jax.random.normal(kb, (c_out,), dtype=jnp.float32) * 0.02
    x = jax.random.normal(
        kx, (batch, num_patches, hidden_size), dtype=jnp.float32
    )

    out = vec_to_patch(x, weight, bias, img_size=img_size, patch_size=patch_size)
    out = jax.block_until_ready(out)
    ref = _reference(x, weight, bias, img_size=img_size, patch_size=patch_size)
    np.testing.assert_allclose(
        np.asarray(out), np.asarray(ref), rtol=1e-4, atol=1e-4
    )

    # bf16 MXU-feed path (cast in-kernel, f32 accumulation), looser tolerance.
    out_bf16 = vec_to_patch(
        x, weight, bias, img_size=img_size, patch_size=patch_size, use_bf16=True
    )
    out_bf16 = jax.block_until_ready(out_bf16)
    np.testing.assert_allclose(
        np.asarray(out_bf16), np.asarray(ref), rtol=5e-2, atol=5e-2
    )
    return out


if __name__ == "__main__":
    key = jax.random.PRNGKey(0)
    k1, k2, k3 = jax.random.split(key, 3)

    # Case 1: the module's small config
    #   img=16, patch=4, hidden=32 -> num_patches=16, C_out = 32//16 = 2
    out = _run_case(k1, batch=2, img_size=16, patch_size=4, hidden_size=32)
    assert out.shape == (2, 2, 16, 16)

    # Case 2: exercises a multi-step k-reduction (H=1024, tk=512 -> nk=2),
    # the direct-write-first-k path, and the bias gating on the last k step.
    out2 = _run_case(k2, batch=2, img_size=32, patch_size=4, hidden_size=1024)
    assert out2.shape == (2, 32, 32, 32)

    # Case 3: C_out == 1 -> torch .squeeze(1) path.
    out3 = _run_case(k3, batch=2, img_size=16, patch_size=4, hidden_size=16)
    assert out3.shape == (2, 16, 16)

    print("KERNEL_OK")
</pallas_src>

<mosaic_0001>
module attributes {stable_mosaic.version = 11 : i64} {
  func.func @_kernel_single_k(%arg0: i32, %arg1: i32, %arg2: i32, %arg3: memref<32x128xf32, #tpu.memory_space<vmem>>, %arg4: memref<128x128xf32, #tpu.memory_space<vmem>>, %arg5: memref<1x128xf32, #tpu.memory_space<vmem>>, %arg6: memref<32x128xf32, #tpu.memory_space<vmem>>) attributes {dimension_semantics = [#tpu.dimension_semantics<parallel>, #tpu.dimension_semantics<parallel>, #tpu.dimension_semantics<arbitrary>], iteration_bounds = array<i64: 1, 1, 1>, scalar_prefetch = 0 : i64, scratch_operands = 0 : i64, tpu.core_type = #tpu.core_type<tc>, window_params = [{transform_indices = @transform_0, window_bounds = array<i64: 32, 128>}, {transform_indices = @transform_1, window_bounds = array<i64: 128, 128>}, {transform_indices = @transform_2, window_bounds = array<i64: 1, 128>}, {transform_indices = @transform_3, window_bounds = array<i64: 32, 128>}]} {
    %c0 = arith.constant 0 : index
    %c0_0 = arith.constant 0 : index
    %0 = vector.load %arg3[%c0, %c0_0] : memref<32x128xf32, #tpu.memory_space<vmem>>, vector<32x128xf32>
    %c0_1 = arith.constant 0 : index
    %c0_2 = arith.constant 0 : index
    %1 = vector.load %arg4[%c0_1, %c0_2] : memref<128x128xf32, #tpu.memory_space<vmem>>, vector<128x128xf32>
    %cst = arith.constant dense<0.000000e+00> : vector<32x128xf32>
    %2 = tpu.matmul %0, %1, %cst {dimension_numbers = #tpu.dot_dimension_numbers<[1], [0], [0], [1], [0, 0, 1, 1], [], []>} : vector<32x128xf32>, vector<128x128xf32>, vector<32x128xf32> -> vector<32x128xf32>
    %c0_3 = arith.constant 0 : index
    %c0_4 = arith.constant 0 : index
    %3 = vector.load %arg5[%c0_3, %c0_4] : memref<1x128xf32, #tpu.memory_space<vmem>>, vector<1x128xf32>
    %4 = vector.broadcast %3 : vector<1x128xf32> to vector<32x128xf32>
    %5 = arith.addf %2, %4 : vector<32x128xf32>
    %c0_5 = arith.constant 0 : index
    %c0_6 = arith.constant 0 : index
    %6 = vector.load %arg6[%c0_5, %c0_6] : memref<32x128xf32, #tpu.memory_space<vmem>>, vector<32x128xf32>
    tpu.vector_store %arg6[%c0_5, %c0_6], %5 {strides = array<i32>} : memref<32x128xf32, #tpu.memory_space<vmem>>, vector<32x128xf32>,
    return
  }
  func.func @transform_0(%arg0: i32, %arg1: i32, %arg2: i32) -> (i32, i32) {
    %c0_i32 = arith.constant 0 : i32
    return %arg1, %arg2 : i32, i32
  }
  func.func @transform_1(%arg0: i32, %arg1: i32, %arg2: i32) -> (i32, i32) {
    %c0_i32 = arith.constant 0 : i32
    return %arg2, %arg0 : i32, i32
  }
  func.func @transform_2(%arg0: i32, %arg1: i32, %arg2: i32) -> (i32, i32) {
    %c0_i32 = arith.constant 0 : i32
    %c0_i32_0 = arith.constant 0 : i32
    return %c0_i32, %arg0 : i32, i32
  }
  func.func @transform_3(%arg0: i32, %arg1: i32, %arg2: i32) -> (i32, i32) {
    %c0_i32 = arith.constant 0 : i32
    return %arg1, %arg0 : i32, i32
  }
}

</mosaic_0001>

<bundles_post_ra>
// kernel: vec_to_patch.1
= control target key start
LH: loop header
LB: loop body
LE: loop exit
PB: predicated region body
PF: predicated region fallthrough
CT: control target
= control target key end

     0   :  { %s219_s1 = inlined_call_operand.vmem [shape: f32[128,128], index: 1, kind: input, shape index: {}]   ;;  %s220_s2 = inlined_call_operand.vmem [shape: f32[1,128], index: 2, kind: input, shape index: {}]   ;;  %s221_s0 = inlined_call_operand.vmem [shape: f32[32,128], index: 0, kind: input, shape index: {}]   ;;  %s222_s3 = inlined_call_operand.vmem [shape: f32[32,128], index: 3, kind: output, shape index: {}]  }
   0x1   :  { %v33_v0 = vld [vmem:[%s219_s1 + $0x78] sm:$0xff]  ;;  %v32_v1 = vld [vmem:[%s219_s1 + $0x70] sm:$0xff]  ;;  %v31_v2 = vld [vmem:[%s219_s1 + $0x68] sm:$0xff] }
   0x2   :  { %76 = vmatpush.msra.mxu2 %v33_v0  ;;  %77 = vmatpush.msra.mxu3 %v33_v0  ;;  %v30_v3 = vld [vmem:[%s219_s1 + $0x60] sm:$0xff]  ;;  %v29_v4 = vld [vmem:[%s219_s1 + $0x58] sm:$0xff]  ;;  %v28_v5 = vld [vmem:[%s219_s1 + $0x50] sm:$0xff] }
   0x3   :  { %38 = vmatpush.msra.mxu0 %v33_v0  ;;  %75 = vmatpush.msra.mxu1 %v33_v0  ;;  %v27_v6 = vld [vmem:[%s219_s1 + $0x48] sm:$0xff]  ;;  %v26_v7 = vld [vmem:[%s219_s1 + $0x40] sm:$0xff]  ;;  %v25_v8 = vld [vmem:[%s219_s1 + $0x38] sm:$0xff] }
   0x4   :  { %79 = vmatpush.msra.mxu2 %v32_v1  ;;  %80 = vmatpush.msra.mxu3 %v32_v1  ;;  %v24_v9 = vld [vmem:[%s219_s1 + $0x30] sm:$0xff]  ;;  %v23_v10 = vld [vmem:[%s219_s1 + $0x28] sm:$0xff]  ;;  %v22_v11 = vld [vmem:[%s219_s1 + $0x20] sm:$0xff] }
   0x5   :  { %39 = vmatpush.msra.mxu0 %v32_v1  ;;  %78 = vmatpush.msra.mxu1 %v32_v1  ;;  %v21_v12 = vld [vmem:[%s219_s1 + $0x18] sm:$0xff]  ;;  %v20_v13 = vld [vmem:[%s219_s1 + $0x10] sm:$0xff]  ;;  %v19_v14 = vld [vmem:[%s219_s1 + $0x8] sm:$0xff] }
   0x6   :  { %82 = vmatpush.msra.mxu2 %v31_v2  ;;  %83 = vmatpush.msra.mxu3 %v31_v2  ;;  %v18_v15 = vld [vmem:[%s219_s1] sm:$0xff]  ;;  %v16_v16 = vld [vmem:[%s221_s0 + $0x10] sm:$0xff]  ;;  %v17_v17 = vld [vmem:[%s221_s0 + $0x18] sm:$0xff] }
   0x7   :  { %40 = vmatpush.msra.mxu0 %v31_v2  ;;  %81 = vmatpush.msra.mxu1 %v31_v2  ;;  %v14_v18 = vld [vmem:[%s221_s0] sm:$0xff]  ;;  %v15_v19 = vld [vmem:[%s221_s0 + $0x8] sm:$0xff] }
   0x8   :  { %85 = vmatpush.msra.mxu2 %v30_v3  ;;  %86 = vmatpush.msra.mxu3 %v30_v3  ;;  %v123_v20 = vld [vmem:[%s220_s2] ss:$0 sm:$0xff] }
   0x9   :  { %41 = vmatpush.msra.mxu0 %v30_v3  ;;  %84 = vmatpush.msra.mxu1 %v30_v3 }
   0xa   :  { %88 = vmatpush.msra.mxu2 %v29_v4  ;;  %89 = vmatpush.msra.mxu3 %v29_v4 }
   0xb   :  { %42 = vmatpush.msra.mxu0 %v29_v4  ;;  %87 = vmatpush.msra.mxu1 %v29_v4 }
   0xc   :  { %91 = vmatpush.msra.mxu2 %v28_v5  ;;  %92 = vmatpush.msra.mxu3 %v28_v5 }
   0xd   :  { %43 = vmatpush.msra.mxu0 %v28_v5  ;;  %90 = vmatpush.msra.mxu1 %v28_v5 }
   0xe   :  { %94 = vmatpush.msra.mxu2 %v27_v6  ;;  %95 = vmatpush.msra.mxu3 %v27_v6 }
   0xf   :  { %44 = vmatpush.msra.mxu0 %v27_v6  ;;  %93 = vmatpush.msra.mxu1 %v27_v6 }
  0x10   :  { %97 = vmatpush.msra.mxu2 %v26_v7  ;;  %98 = vmatpush.msra.mxu3 %v26_v7 }
  0x11   :  { %45 = vmatpush.msra.mxu0 %v26_v7  ;;  %96 = vmatpush.msra.mxu1 %v26_v7 }
  0x12   :  { %100 = vmatpush.msra.mxu2 %v25_v8  ;;  %101 = vmatpush.msra.mxu3 %v25_v8 }
  0x13   :  { %46 = vmatpush.msra.mxu0 %v25_v8  ;;  %99 = vmatpush.msra.mxu1 %v25_v8 }
  0x14   :  { %103 = vmatpush.msra.mxu2 %v24_v9  ;;  %104 = vmatpush.msra.mxu3 %v24_v9 }
  0x15   :  { %47 = vmatpush.msra.mxu0 %v24_v9  ;;  %102 = vmatpush.msra.mxu1 %v24_v9 }
  0x16   :  { %106 = vmatpush.msra.mxu2 %v23_v10  ;;  %107 = vmatpush.msra.mxu3 %v23_v10 }
  0x17   :  { %48 = vmatpush.msra.mxu0 %v23_v10  ;;  %105 = vmatpush.msra.mxu1 %v23_v10 }
  0x18   :  { %109 = vmatpush.msra.mxu2 %v22_v11  ;;  %110 = vmatpush.msra.mxu3 %v22_v11 }
  0x19   :  { %49 = vmatpush.msra.mxu0 %v22_v11  ;;  %108 = vmatpush.msra.mxu1 %v22_v11 }
  0x1a   :  { %112 = vmatpush.msra.mxu2 %v21_v12  ;;  %113 = vmatpush.msra.mxu3 %v21_v12 }
  0x1b   :  { %50 = vmatpush.msra.mxu0 %v21_v12  ;;  %111 = vmatpush.msra.mxu1 %v21_v12 }
  0x1c   :  { %115 = vmatpush.msra.mxu2 %v20_v13  ;;  %116 = vmatpush.msra.mxu3 %v20_v13 }
  0x1d   :  { %51 = vmatpush.msra.mxu0 %v20_v13  ;;  %114 = vmatpush.msra.mxu1 %v20_v13 }
  0x1e   :  { %118 = vmatpush.msra.mxu2 %v19_v14  ;;  %119 = vmatpush.msra.mxu3 %v19_v14 }
  0x1f   :  { %52 = vmatpush.msra.mxu0 %v19_v14  ;;  %117 = vmatpush.msra.mxu1 %v19_v14 }
  0x20   :  { %121 = vmatpush.msra.mxu2 %v18_v15  ;;  %122 = vmatpush.msra.mxu3 %v18_v15 }
  0x21   :  { %60 = vmatmul.f32.vlgmr.msra.gmra.mxu2 %v16_v16  ;;  %63 = vmatmul.f32.vlgmr.msra.gmra.mxu3 %v17_v17 }
  0x22   :  { %53 = vmatpush.msra.mxu0 %v18_v15  ;;  %120 = vmatpush.msra.mxu1 %v18_v15 }
  0x23   :  { %54 = vmatmul.f32.vlgmr.msra.gmra.mxu0 %v14_v18  ;;  %57 = vmatmul.f32.vlgmr.msra.gmra.mxu1 %v15_v19 }
  0xa0   :  { %v55_v21 = vpop.f32.mrf.mxu0  ;;  %v58_v22 = vpop.f32.mrf.mxu1 }
  0xa1   :  { %v56_v23 = vadd.f32 %v123_v20, %v55_v21  ;;  %v59_v24 = vadd.f32 %v123_v20, %v58_v22 }
  0xa3   :  { %67 = vst [vmem:[%s222_s3] sm:$0xff] %v56_v23 }
  0xa4   :  { %68 = vst [vmem:[%s222_s3 + $0x8] sm:$0xff] %v59_v24  ;;  %v61_v25 = vpop.f32.mrf.mxu2  ;;  %v64_v26 = vpop.f32.mrf.mxu3 }
  0xa5   :  { %v62_v27 = vadd.f32 %v123_v20, %v61_v25  ;;  %v65_v28 = vadd.f32 %v123_v20, %v64_v26 }
  0xa7   :  { %69 = vst [vmem:[%s222_s3 + $0x10] sm:$0xff] %v62_v27 }
  0xa8   :  { %70 = vst [vmem:[%s222_s3 + $0x18] sm:$0xff] %v65_v28 }

</bundles_post_ra>
